<compile_context>
chip_gen: v5e
topology: v5e:2x2
jax: 0.10.0
libtpu: 0.0.40
codegen_flags: <defaults>
</compile_context>

<pallas_src>
import functools

import jax
import jax.numpy as jnp
import numpy as np
from jax import lax
from jax.experimental import pallas as pl
from jax.experimental.pallas import tpu as pltpu

LANE = 128
SUB = 8
BLOCK_ROWS_MAX = 2048  # 2048*128*4B = 1 MiB f32 per input buffer (fits v5e/v7x defaults)


def _round_up(x, m):
    return ((x + m - 1) // m) * m


def _focal_kernel(x_ref, t_ref, o_ref, *, alpha, gamma, n_valid):
    """One (block_rows, 128) tile: focal loss + masked partial sum into o_ref."""
    j = pl.program_id(1)

    @pl.when(j == 0)
    def _():
        o_ref[...] = jnp.zeros_like(o_ref)

    block_rows, lane = x_ref.shape

    x = x_ref[...].astype(jnp.float32)
    t = t_ref[...].astype(jnp.float32)

    # Numerically stable BCE-with-logits: max(x,0) - x*t + log1p(exp(-|x|)),
    # reusing z = exp(-|x|).
    z = jnp.exp(-jnp.abs(x))
    bce = jnp.maximum(x, 0.0) - x * t + jnp.log1p(z)

    # alpha.gather(0, targets.long()) with alpha_table = [alpha, 1-alpha].
    # Matches the PyTorch gather exactly for binary {0,1} targets.
    t_i = t.astype(jnp.int32)
    at = jnp.where(t_i == 1, jnp.float32(1.0 - alpha), jnp.float32(alpha))

    pt = jnp.exp(-bce)
    one_m_pt = 1.0 - pt
    g = float(gamma)
    if g == int(g):
        focal = lax.integer_pow(one_m_pt, int(g))  # no exp/log pow on the EUP
    else:
        focal = one_m_pt ** jnp.float32(g)
    f_loss = at * focal * bce

    # In-kernel validity mask (replaces the HBM mask stream and tile padding).
    # TODO(synk): flat index is int32; for N >= 2**31 elements switch to int64 math.
    blk = pl.program_id(0) * pl.num_programs(1) + j
    row_ids = lax.broadcasted_iota(jnp.int32, (block_rows, lane), 0)
    lane_ids = lax.broadcasted_iota(jnp.int32, (block_rows, lane), 1)
    flat_idx = (blk * block_rows + row_ids) * lane + lane_ids
    f_loss = jnp.where(flat_idx < n_valid, f_loss, 0.0)  # select: garbage can't leak

    # Sublane-fold the block into the resident (8, 128) accumulator (pure VPU).
    o_ref[...] += jnp.sum(f_loss.reshape(block_rows // SUB, SUB, lane), axis=0)


def weighted_focal_loss(inputs, targets, alpha=0.01, gamma=2,
                        block_rows_max=BLOCK_ROWS_MAX):
    """Pallas implementation of WeightedFocalLoss.forward -> scalar mean."""
    x = inputs.reshape(-1).astype(jnp.float32)
    # bf16 labels: exact for binary {0,1} targets, halves the label HBM stream.
    t = targets.reshape(-1).astype(jnp.bfloat16)
    n = x.shape[0]

    # Only pad up to the next 128-lane multiple (needed for the free 2-D reshape).
    n_lane = _round_up(n, LANE)
    if n_lane != n:
        x = jnp.pad(x, (0, n_lane - n))
        t = jnp.pad(t, (0, n_lane - n))
    rows = n_lane // LANE

    # Block rows: big tiles for big inputs, exact/near-exact fit for small ones.
    if rows <= block_rows_max:
        block_rows = _round_up(rows, 16)  # mult. of 16: valid for f32 & bf16 tiles
    else:
        block_rows = block_rows_max

    total_blocks = (rows + block_rows - 1) // block_rows
    num_parts = min(2, total_blocks)            # 2-way split feeds both v7x cores
    bpp = (total_blocks + num_parts - 1) // num_parts

    x2 = x.reshape(rows, LANE)
    t2 = t.reshape(rows, LANE)

    def in_map(i, j):
        # Clamp so a (rare) fully out-of-range logical block aliases the last
        # real block; its contribution is zeroed by the in-kernel index mask.
        return (jnp.minimum(i * bpp + j, total_blocks - 1), 0)

    kern = functools.partial(
        _focal_kernel, alpha=float(alpha), gamma=float(gamma), n_valid=int(n)
    )

    partial_sums = pl.pallas_call(
        kern,
        out_shape=jax.ShapeDtypeStruct((num_parts * SUB, LANE), jnp.float32),
        grid_spec=pltpu.PrefetchScalarGridSpec(
            num_scalar_prefetch=0,
            grid=(num_parts, bpp),
            in_specs=[
                pl.BlockSpec((block_rows, LANE), in_map),
                pl.BlockSpec((block_rows, LANE), in_map),
            ],
            out_specs=pl.BlockSpec((SUB, LANE), lambda i, j: (i, 0)),
        ),
        compiler_params=pltpu.CompilerParams(
            dimension_semantics=("parallel", "arbitrary"),
        ),
    )(x2, t2)

    # Single tiny cross-lane reduce + mean, outside the hot loop.
    return jnp.sum(partial_sums) / jnp.float32(n)


def _reference(inputs, targets, alpha=0.01, gamma=2):
    # pure-JAX reference mirroring the PyTorch forward
    x = inputs.reshape(-1).astype(jnp.float32)
    t = targets.reshape(-1).astype(jnp.float32)
    bce = jnp.maximum(x, 0.0) - x * t + jnp.log1p(jnp.exp(-jnp.abs(x)))
    alpha_tbl = jnp.array([alpha, 1.0 - alpha], jnp.float32)
    at = alpha_tbl[t.astype(jnp.int32)]
    pt = jnp.exp(-bce)
    return jnp.mean(at * (1.0 - pt) ** gamma * bce)


if __name__ == "__main__":
    key = jax.random.PRNGKey(0)
    k1, k2 = jax.random.split(key)

    N = 2048  # flat logits / binary labels (e.g. flattened detection head output)
    logits = jax.random.normal(k1, (N,), dtype=jnp.float32) * 2.0
    labels = (jax.random.uniform(k2, (N,)) < 0.3).astype(jnp.float32)

    loss = weighted_focal_loss(logits, labels, alpha=0.01, gamma=2)
    loss = jax.block_until_ready(loss)

    ref = jax.block_until_ready(_reference(logits, labels, alpha=0.01, gamma=2))
    np.testing.assert_allclose(np.asarray(loss), np.asarray(ref), rtol=1e-5, atol=1e-6)

    print("KERNEL_OK")
</pallas_src>

<mosaic_0001>
module attributes {stable_mosaic.version = 11 : i64} {
  func.func @_focal_kernel(%arg0: i32, %arg1: i32, %arg2: memref<16x128xf32, #tpu.memory_space<vmem>>, %arg3: memref<16x128xbf16, #tpu.memory_space<vmem>>, %arg4: memref<8x128xf32, #tpu.memory_space<vmem>>) attributes {dimension_semantics = [#tpu.dimension_semantics<parallel>, #tpu.dimension_semantics<arbitrary>], iteration_bounds = array<i64: 1, 1>, scalar_prefetch = 0 : i64, scratch_operands = 0 : i64, tpu.core_type = #tpu.core_type<tc>, window_params = [{transform_indices = @transform_0, window_bounds = array<i64: 16, 128>}, {transform_indices = @transform_1, window_bounds = array<i64: 16, 128>}, {transform_indices = @transform_2, window_bounds = array<i64: 8, 128>}]} {
    %c0_i32 = arith.constant 0 : i32
    %0 = arith.cmpi eq, %arg1, %c0_i32 : i32
    %1 = arith.extui %0 : i1 to i32
    %c0_i32_0 = arith.constant 0 : i32
    %2 = arith.cmpi ne, %1, %c0_i32_0 : i32
    scf.if %2 {
      %cst_16 = arith.constant 0.000000e+00 : f32
      %49 = vector.broadcast %cst_16 : f32 to vector<8x128xf32>
      %c0_17 = arith.constant 0 : index
      %c0_18 = arith.constant 0 : index
      %50 = vector.load %arg4[%c0_17, %c0_18] : memref<8x128xf32, #tpu.memory_space<vmem>>, vector<8x128xf32>
      tpu.vector_store %arg4[%c0_17, %c0_18], %49 {strides = array<i32>} : memref<8x128xf32, #tpu.memory_space<vmem>>, vector<8x128xf32>,
    } else {
    }
    %c0 = arith.constant 0 : index
    %c0_1 = arith.constant 0 : index
    %3 = vector.load %arg2[%c0, %c0_1] : memref<16x128xf32, #tpu.memory_space<vmem>>, vector<16x128xf32>
    %c0_2 = arith.constant 0 : index
    %c0_3 = arith.constant 0 : index
    %4 = vector.load %arg3[%c0_2, %c0_3] : memref<16x128xbf16, #tpu.memory_space<vmem>>, vector<16x128xbf16>
    %5 = arith.extf %4 : vector<16x128xbf16> to vector<16x128xf32>
    %6 = math.absf %3 : vector<16x128xf32>
    %cst = arith.constant 0.000000e+00 : f32
    %7 = vector.broadcast %cst : f32 to vector<16x128xf32>
    %8 = arith.subf %7, %6 : vector<16x128xf32>
    %9 = math.exp %8 : vector<16x128xf32>
    %cst_4 = arith.constant 0.000000e+00 : f32
    %10 = vector.broadcast %cst_4 : f32 to vector<16x128xf32>
    %11 = arith.maximumf %3, %10 : vector<16x128xf32>
    %12 = arith.mulf %3, %5 : vector<16x128xf32>
    %13 = arith.subf %11, %12 : vector<16x128xf32>
    %14 = math.log1p %9 : vector<16x128xf32>
    %15 = arith.addf %13, %14 : vector<16x128xf32>
    %16 = arith.fptosi %5 : vector<16x128xf32> to vector<16x128xi32>
    %c1_i32 = arith.constant 1 : i32
    %17 = vector.broadcast %c1_i32 : i32 to vector<16x128xi32>
    %18 = arith.cmpi eq, %16, %17 : vector<16x128xi32>
    %cst_5 = arith.constant 9.900000e-01 : f32
    %cst_6 = arith.constant 0.00999999977 : f32
    %19 = vector.broadcast %cst_5 : f32 to vector<16x128xf32>
    %20 = vector.broadcast %cst_6 : f32 to vector<16x128xf32>
    %21 = arith.select %18, %19, %20 : vector<16x128xi1>, vector<16x128xf32>
    %cst_7 = arith.constant 0.000000e+00 : f32
    %22 = vector.broadcast %cst_7 : f32 to vector<16x128xf32>
    %23 = arith.subf %22, %15 : vector<16x128xf32>
    %24 = math.exp %23 : vector<16x128xf32>
    %cst_8 = arith.constant 1.000000e+00 : f32
    %25 = vector.broadcast %cst_8 : f32 to vector<16x128xf32>
    %26 = arith.subf %25, %24 : vector<16x128xf32>
    %27 = arith.mulf %26, %26 : vector<16x128xf32>
    %28 = arith.mulf %21, %27 : vector<16x128xf32>
    %29 = arith.mulf %28, %15 : vector<16x128xf32>
    %c1_i32_9 = arith.constant 1 : i32
    %30 = arith.muli %arg0, %c1_i32_9 : i32
    %31 = arith.addi %30, %arg1 : i32
    %32 = tpu.iota {dimensions = array<i32: 0>} : vector<16x128xi32>
    %33 = tpu.iota {dimensions = array<i32: 1>} : vector<16x128xi32>
    %c16_i32 = arith.constant 16 : i32
    %34 = arith.muli %31, %c16_i32 : i32
    %35 = vector.broadcast %34 : i32 to vector<16x128xi32>
    %36 = arith.addi %35, %32 : vector<16x128xi32>
    %c128_i32 = arith.constant 128 : i32
    %37 = vector.broadcast %c128_i32 : i32 to vector<16x128xi32>
    %38 = arith.muli %36, %37 : vector<16x128xi32>
    %39 = arith.addi %38, %33 : vector<16x128xi32>
    %c2048_i32 = arith.constant 2048 : i32
    %40 = vector.broadcast %c2048_i32 : i32 to vector<16x128xi32>
    %41 = arith.cmpi slt, %39, %40 : vector<16x128xi32>
    %cst_10 = arith.constant 0.000000e+00 : f32
    %42 = vector.broadcast %cst_10 : f32 to vector<16x128xf32>
    %43 = arith.select %41, %29, %42 : vector<16x128xi1>, vector<16x128xf32>
    %c0_11 = arith.constant 0 : index
    %c0_12 = arith.constant 0 : index
    %44 = vector.load %arg4[%c0_11, %c0_12] : memref<8x128xf32, #tpu.memory_space<vmem>>, vector<8x128xf32>
    %45 = vector.shape_cast %43 : vector<16x128xf32> to vector<2x8x128xf32>
    %cst_13 = arith.constant dense<0.000000e+00> : vector<8x128xf32>
    %46 = vector.multi_reduction <add>, %45, %cst_13 [0] : vector<2x8x128xf32> to vector<8x128xf32>
    %47 = arith.addf %44, %46 : vector<8x128xf32>
    %c0_14 = arith.constant 0 : index
    %c0_15 = arith.constant 0 : index
    %48 = vector.load %arg4[%c0_14, %c0_15] : memref<8x128xf32, #tpu.memory_space<vmem>>, vector<8x128xf32>
    tpu.vector_store %arg4[%c0_14, %c0_15], %47 {strides = array<i32>} : memref<8x128xf32, #tpu.memory_space<vmem>>, vector<8x128xf32>,
    return
  }
  func.func @transform_0(%arg0: i32, %arg1: i32) -> (i32, i32) {
    %c1_i32 = arith.constant 1 : i32
    %0 = arith.muli %arg0, %c1_i32 : i32
    %1 = arith.addi %0, %arg1 : i32
    %c0_i32 = arith.constant 0 : i32
    %2 = arith.minsi %1, %c0_i32 : i32
    %c0_i32_0 = arith.constant 0 : i32
    %c0_i32_1 = arith.constant 0 : i32
    return %2, %c0_i32_0 : i32, i32
  }
  func.func @transform_1(%arg0: i32, %arg1: i32) -> (i32, i32) {
    %c1_i32 = arith.constant 1 : i32
    %0 = arith.muli %arg0, %c1_i32 : i32
    %1 = arith.addi %0, %arg1 : i32
    %c0_i32 = arith.constant 0 : i32
    %2 = arith.minsi %1, %c0_i32 : i32
    %c0_i32_0 = arith.constant 0 : i32
    %c0_i32_1 = arith.constant 0 : i32
    return %2, %c0_i32_0 : i32, i32
  }
  func.func @transform_2(%arg0: i32, %arg1: i32) -> (i32, i32) {
    %c0_i32 = arith.constant 0 : i32
    %c0_i32_0 = arith.constant 0 : i32
    return %arg0, %c0_i32 : i32, i32
  }
}

</mosaic_0001>

<bundles_post_ra>
// kernel: tpu_custom_call.1
= control target key start
LH: loop header
LB: loop body
LE: loop exit
PB: predicated region body
PF: predicated region fallthrough
CT: control target
= control target key end

     0   :  { %7 = vsyncpa [#allocation3], 0  ;;  %s318_s0 = inlined_call_operand.hbm [shape: f32[16,128], index: 0, kind: input, shape index: {}]   ;;  %s319_s1 = inlined_call_operand.hbm [shape: bf16[16,128], index: 1, kind: input, shape index: {}]   ;;  %s320_s2 = inlined_call_operand.hbm [shape: f32[8,128], index: 2, kind: output, shape index: {}]  }
   0x1   :  { %8 = vsyncpa [#allocation6], 0 }
   0x2   :  { %9 = vsyncpa [#allocation4], 0  ;;  %s20_s11 = sshll.u32 %s318_s0, 4  ;;  %s286_s12 = smov [#allocation2]   ;;  %s21_s11 = int_to_ptr.hbm [resolvable:$true] %s20_s11 }
   0x3   :  { %s22_s13 = sshll.u32 %s286_s12, 4  ;;  %s39_s16 = sshll.u32 %s319_s1, 4  ;;  %s23_s13 = int_to_ptr.vmem [resolvable:$true] %s22_s13  ;;  %s40_s16 = int_to_ptr.hbm [resolvable:$true] %s39_s16 }
   0x4   :  { %s287_s17 = smov 128   ;;  %s288_s18 = smov 8  }
   0x5   :  { %28 = dma.hbm_to_vmem [thread:$0]  %s21_s11, 256, %s23_s13, [#allocation3], %s287_s17, %s287_s17, %s288_s18  }
   0x6   :  { %s289_s19 = smov [#allocation5]   ;;  %s290_s21 = smov 64  }
   0x7   :  { %s41_s20 = sshll.u32 %s289_s19, 4  ;;  %s291_s22 = smov 4   ;;  %s42_s20 = int_to_ptr.vmem [resolvable:$true] %s41_s20 }
   0x8   :  { %47 = dma.hbm_to_vmem [thread:$0]  %s40_s16, 128, %s42_s20, [#allocation6], %s290_s21, %s290_s21, %s291_s22  }
   0x9   :  { %280 = dma.done.wait [#allocation3], 256  }
   0xa   :  { %281 = vsyncadd [#allocation3], 4294967040 }
   0xb   :  { %282 = dma.done.wait [#allocation6], 128  }
   0xc   :  { %283 = vsyncadd [#allocation6], 4294967168  ;;  %v69_v0 = vld [vmem:[#allocation2] sm:$0xff]  ;;  %v70_v1 = vld [vmem:[#allocation2 + $0x8] sm:$0xff]  ;;  %v130_v34 = vlaneseq  ;;  %v292_v58 = vmov 0.01  }
   0xd   :  { %v75_v2 = vand.u32 2147483647, %v69_v0  ;;  %v76_v3 = vand.u32 2147483647, %v70_v1  ;;  %v174_v8 = vld [vmem:[#allocation5] sm:$0xff]   ;;  %v83_v18 = vmax.f32 %v69_v0, 0.0 }
   0xe   :  { %v175_v11 = vunpack.c.l.bf16 %v174_v8  ;;  %v176_v14 = vunpack.c.h.bf16 %v174_v8  ;;  %v84_v22 = vmax.f32 %v70_v1, 0.0  ;;  %v131_v44 = vshrl.u32 %v130_v34, 7  ;;  %s293_s0 = smov [#allocation7]   ;;  %s158_s25 = sshll.u32 %s320_s2, 4  ;;  %s159_s25 = int_to_ptr.hbm [resolvable:$true] %s158_s25 }
   0xf   :  { %v77_v4 = vsub.f32 0.0, %v75_v2  ;;  %v78_v5 = vsub.f32 0.0, %v76_v3  ;;  %v134_v52 = vand.u32 127, %v130_v34  ;;  %s156_s1 = sshll.u32 %s293_s0, 4  ;;  %s157_s1 = int_to_ptr.vmem [resolvable:$true] %s156_s1 }
  0x10   :  { %v85_v19 = vmul.f32 %v175_v11, %v69_v0  ;;  %v86_v23 = vmul.f32 %v176_v14, %v70_v1  ;;  %v178_v37 = vceil.f32 %v175_v11  ;;  %v179_v38 = vfloor.f32 %v175_v11 }
  0x11   :  { %v79_v6 = vmul.f32 1.442695, %v77_v4  ;;  %v81_v7 = vmul.f32 1.442695, %v78_v5  ;;  %vm177_vm2 = vcmp.lt.s32.totalorder %v175_v11, 0  ;;  %v183_v40 = vceil.f32 %v176_v14 }
  0x12   :  { %v87_v27 = vsub.f32 %v83_v18, %v85_v19  ;;  %v88_v30 = vsub.f32 %v84_v22, %v86_v23  ;;  %v184_v41 = vfloor.f32 %v176_v14  ;;  %vm182_vm3 = vcmp.lt.s32.totalorder %v176_v14, 0 }
  0x13   :  { %196 = vpow2.f32 %v79_v6  ;;  %v180_v45 = vsel %vm177_vm2, %v178_v37, %v179_v38  ;;  %v132_v50 = vadd.s32 8, %v131_v44  ;;  %v139_v53 = vmul.u32 128, %v131_v44 }
  0x14   :  { %198 = vpow2.f32 %v81_v7  ;;  %v185_v47 = vsel %vm182_vm3, %v183_v40, %v184_v41  ;;  %v181_v49 = vcvt.f32.s32 %v180_v45 }
  0x15   :  { %v186_v51 = vcvt.f32.s32 %v185_v47  ;;  %v140_v54 = vmul.u32 128, %v132_v50  ;;  %v141_v61 = vadd.s32 %v139_v53, %v134_v52 }
  0x16   :  { %vm111_vm4 = vcmp.eq.s32.totalorder %v181_v49, 1 }
  0x17   :  { %vm112_vm5 = vcmp.eq.s32.totalorder %v186_v51, 1  ;;  %v113_v59 = vsel %vm111_vm4, 0.99, %v292_v58  ;;  %v142_v0 = vadd.s32 %v140_v54, %v134_v52  ;;  %vm143_vm6 = vcmp.lt.s32.totalorder %v141_v61, 2048 }
  0x18   :  { %v114_v62 = vsel %vm112_vm5, 0.99, %v292_v58 }
  0x19   :  { %v197_v9 = vpop.eup %196  ;;  %vm144_vm7 = vcmp.lt.s32.totalorder %v142_v0, 2048 }
  0x1a   :  { %v199_v10 = vpop.eup %198  ;;  %v89_v12 = vadd.f32 1.0, %v197_v9  ;;  %v92_v13 = vmul.f32 -0.5, %v197_v9  ;;  %v95_v20 = vand.u32 2147483647, %v197_v9 }
  0x1b   :  { %v98_v15 = vadd.f32 1.0, %v199_v10  ;;  %v101_v16 = vmul.f32 -0.5, %v199_v10  ;;  %v104_v24 = vand.u32 2147483647, %v199_v10 }
  0x1c   :  { %200 = vlog2.f32 %v89_v12  ;;  %v93_v17 = vadd.f32 1.0, %v92_v13  ;;  %vm96_vm0 = vcmp.lt.f32.partialorder %v95_v20, 0.0004427343 }
  0x1d   :  { %202 = vlog2.f32 %v98_v15  ;;  %v102_v21 = vadd.f32 1.0, %v101_v16  ;;  %vm105_vm1 = vcmp.lt.f32.partialorder %v104_v24, 0.0004427343 }
  0x1e   :  { %v94_v25 = vmul.f32 %v197_v9, %v93_v17 }
  0x1f   :  { %v103_v28 = vmul.f32 %v199_v10, %v102_v21 }
  0x22   :  { %v201_v26 = vpop.eup %200 }
  0x23   :  { %v203_v29 = vpop.eup %202  ;;  %v91_v31 = vmul.f32 0.6931472, %v201_v26 }
  0x24   :  { %v100_v32 = vmul.f32 0.6931472, %v203_v29 }
  0x25   :  { %v97_v33 = vsel %vm96_vm0, %v94_v25, %v91_v31 }
  0x26   :  { %v106_v35 = vsel %vm105_vm1, %v103_v28, %v100_v32  ;;  %v107_v36 = vadd.f32 %v97_v33, %v87_v27 }
  0x27   :  { %v108_v39 = vadd.f32 %v106_v35, %v88_v30 }
  0x28   :  { %v115_v42 = vsub.f32 0.0, %v107_v36 }
  0x29   :  { %v116_v43 = vsub.f32 0.0, %v108_v39 }
  0x2a   :  { %v117_v46 = vmul.f32 1.442695, %v115_v42 }
  0x2b   :  { %v119_v48 = vmul.f32 1.442695, %v116_v43 }
  0x2c   :  { %204 = vpow2.f32 %v117_v46 }
  0x2d   :  { %206 = vpow2.f32 %v119_v48 }
  0x32   :  { %v205_v55 = vpop.eup %204 }
  0x33   :  { %v207_v56 = vpop.eup %206  ;;  %v121_v57 = vsub.f32 1.0, %v205_v55 }
  0x34   :  { %v122_v60 = vsub.f32 1.0, %v207_v56 }
  0x35   :  { %v123_v63 = vmul.f32 %v121_v57, %v121_v57 }
  0x36   :  { %v124_v1 = vmul.f32 %v122_v60, %v122_v60 }
  0x37   :  { %v125_v2 = vmul.f32 %v123_v63, %v113_v59 }
  0x38   :  { %v126_v3 = vmul.f32 %v124_v1, %v114_v62 }
  0x39   :  { %v127_v4 = vmul.f32 %v125_v2, %v107_v36 }
  0x3a   :  { %v128_v5 = vmul.f32 %v126_v3, %v108_v39 }
  0x3b   :  { %v145_v6 = vsel %vm143_vm6, %v127_v4, 0.0 }
  0x3c   :  { %v146_v7 = vsel %vm144_vm7, %v128_v5, 0.0 }
  0x3d   :  { %v148_v8 = vadd.f32 %v146_v7, %v145_v6 }
  0x3f   :  { %150 = vst [vmem:[#allocation7] sm:$0xff] %v148_v8 }
  0x40   :  { %161 = dma.vmem_to_hbm [thread:$0]  %s157_s1, 128, %s159_s25, [#allocation4]  }
  0x41   :  { %284 = dma.done.wait [#allocation4], 128  }
  0x42   :  { %285 = vsyncadd [#allocation4], 4294967168 }
  0x43   :  { %166 = vsyncpa [#allocation3], 1 }
  0x44   :  { %167 = vsyncpa [#allocation6], 1 }
  0x45   :  { %168 = vsyncpa [#allocation4], 1 }

</bundles_post_ra>
